<compile_context>
chip_gen: v6e
topology: v6e:2x2x1
jax: 0.10.0
libtpu: 0.0.40
codegen_flags: <defaults>
</compile_context>

<pallas_src>
import functools
import math

import jax
import jax.numpy as jnp
from jax import lax
from jax.experimental import pallas as pl
from jax.experimental.pallas import tpu as pltpu

_HALF_LOG_2PI = 0.5 * math.log(2.0 * math.pi)
_RHO_PAD_FILL = -1e9  # softplus(-1e9) == 0 exactly -> padded weights/biases are exact zeros


def _round_up(x, m):
    return ((x + m - 1) // m) * m


# ---------------------------------------------------------------------------
# Cold-path kernel: run ONCE per parameter update, per layer.
# Deterministic "posterior sample" + standard-normal log-prior for that layer.
# ---------------------------------------------------------------------------
def _prepare_layer_kernel(wmu_ref, wrho_ref, bmu_ref, brho_ref,
                          w_ref, b_ref, logp_ref, *, n_true_params):
    # Inputs are already pre-transposed + padded: wmu/wrho are (pad_in, pad_out),
    # bmu/brho are (1, pad_out). Padded rho entries are -1e9 -> softplus == 0 exactly.
    w = wmu_ref[...] + jax.nn.softplus(wrho_ref[...])
    b = bmu_ref[...] + jax.nn.softplus(brho_ref[...])
    w_ref[...] = w
    b_ref[...] = b
    # Padded entries of w/b are exact zeros -> add 0 to the sum of squares.
    # The constant count term is folded at trace time with the TRUE element count.
    logp_ref[0, 0] = (-0.5 * (jnp.sum(w * w) + jnp.sum(b * b))
                      - jnp.float32(n_true_params * _HALF_LOG_2PI))


# ---------------------------------------------------------------------------
# Hot-path kernel: fused affine + ReLU chain over all layers (matmul-only).
# refs layout: (x, w0, b0, w1, b1, ..., w_{L-1}, b_{L-1}, y)
# ---------------------------------------------------------------------------
def _mlp_forward_kernel(*refs, n_layers):
    x_ref = refs[0]
    y_ref = refs[1 + 2 * n_layers]

    h = x_ref[...]                                    # (tb, pad_in0), padded cols are 0
    # TODO(synk): for deep nets with uniform layer widths, replace this static unroll
    # with a layer-axis grid (P3/P4) so only one layer's weights is VMEM-resident.
    for l in range(n_layers):
        w_ref = refs[1 + 2 * l]                       # (pad_in_l, pad_out_l), pre-transposed
        b_ref = refs[2 + 2 * l]                       # (1, pad_out_l)
        # Plain h @ w on the MXU: contract h's last dim with w's FIRST dim
        # (weights were pre-transposed on the host -> no XLU relayout).
        h = lax.dot_general(h, w_ref[...],
                            dimension_numbers=(((1,), (0,)), ((), ())),
                            preferred_element_type=jnp.float32) + b_ref[...]
        if l < n_layers - 1:
            h = jnp.maximum(h, 0.0)
    y_ref[...] = h.astype(y_ref.dtype)


class BayesNetPallas:
    """JAX/Pallas port of BayesNet: stack of BayesianLayers with ReLU in between."""

    def __init__(self, in_features, hidden_features, out_features, key):
        sizes = (in_features,) + tuple(hidden_features) + (out_features,)
        self.sizes = sizes
        self.in_features = in_features
        self.out_features = out_features

        num_layers = len(sizes) - 1
        self.num_layers = num_layers
        self.layer_dims = tuple((sizes[i], sizes[i + 1]) for i in range(num_layers))
        # Per-layer padded dims (lane-dense). Note pad_in[l+1] == pad_out[l] by construction,
        # so activations chain exactly with no slicing between layers.
        self.pad_in = tuple(_round_up(fin, 128) for (fin, _) in self.layer_dims)
        self.pad_out = tuple(_round_up(fout, 128) for (_, fout) in self.layer_dims)

        # Raw (unpadded) parameters (PyTorch (fout, fin) convention), kept for reference check.
        self.params = []
        keys = jax.random.split(key, num_layers * 4)
        for idx in range(num_layers):
            fin, fout = self.layer_dims[idx]
            k0, k1, k2, k3 = keys[idx * 4: idx * 4 + 4]
            mu_w = 0.01 * jax.random.normal(k0, (fout, fin), jnp.float32)
            rho_w = -2.5 + 0.01 * jax.random.normal(k1, (fout, fin), jnp.float32)
            mu_b = 0.01 * jax.random.normal(k2, (fout,), jnp.float32)
            rho_b = -2.5 + 0.01 * jax.random.normal(k3, (fout,), jnp.float32)
            self.params.append((mu_w, rho_w, mu_b, rho_b))

        self._refresh()

    # Recompute the cached (deterministic) weight sample + log-prior. Call after any
    # parameter update; the per-forward hot path reuses the cached values.
    def _refresh(self):
        self.w_pads = []
        self.b_pads = []
        log_prior = jnp.float32(0.0)

        for idx, (mu_w, rho_w, mu_b, rho_b) in enumerate(self.params):
            fin, fout = self.layer_dims[idx]
            pin, pout = self.pad_in[idx], self.pad_out[idx]

            # Pre-transposed + padded mu/rho: (pin, pout) for weights, (1, pout) for bias.
            wmu_t = jnp.zeros((pin, pout), jnp.float32).at[:fin, :fout].set(mu_w.T)
            wrho_t = jnp.full((pin, pout), _RHO_PAD_FILL, jnp.float32).at[:fin, :fout].set(rho_w.T)
            bmu_p = jnp.zeros((1, pout), jnp.float32).at[0, :fout].set(mu_b)
            brho_p = jnp.full((1, pout), _RHO_PAD_FILL, jnp.float32).at[0, :fout].set(rho_b)

            prep = pl.pallas_call(
                functools.partial(_prepare_layer_kernel, n_true_params=fin * fout + fout),
                out_shape=(
                    jax.ShapeDtypeStruct((pin, pout), jnp.float32),
                    jax.ShapeDtypeStruct((1, pout), jnp.float32),
                    jax.ShapeDtypeStruct((1, 1), jnp.float32),
                ),
                in_specs=[pl.BlockSpec(memory_space=pltpu.MemorySpace.VMEM)] * 4,
                out_specs=(
                    pl.BlockSpec(memory_space=pltpu.MemorySpace.VMEM),
                    pl.BlockSpec(memory_space=pltpu.MemorySpace.VMEM),
                    pl.BlockSpec(memory_space=pltpu.MemorySpace.SMEM),
                ),
            )
            w_pad, b_pad, logp = prep(wmu_t, wrho_t, bmu_p, brho_p)
            self.w_pads.append(w_pad)
            self.b_pads.append(b_pad)
            log_prior = log_prior + logp[0, 0]

        self.log_prior = log_prior

    def forward(self, x):
        batch = x.shape[0]
        pin0 = self.pad_in[0]
        pout_last = self.pad_out[-1]
        n_layers = self.num_layers

        # Batch tiling: a single sublane-aligned tile for small batches; 256-row tiles
        # (good MXU LHS height) sharded "parallel" across TensorCores for large batches
        # (e.g. when MC samples are folded into the batch dim).
        if batch <= 256:
            tb = _round_up(batch, 8)
            batch_pad = tb
        else:
            tb = 256
            batch_pad = _round_up(batch, tb)
        grid = (batch_pad // tb,)

        # Zero-pad input to a lane-dense, sublane-aligned tile.
        x_pad = jnp.zeros((batch_pad, pin0), jnp.float32)
        x_pad = x_pad.at[:batch, :self.in_features].set(x.astype(jnp.float32))

        # Weight/bias/activation footprint -> explicit scoped-VMEM limit (v5e default is 16 MiB)
        # and a cost estimate so XLA schedules the surrounding pad/slice ops sensibly.
        param_bytes = 4 * sum(pi * po + po for pi, po in zip(self.pad_in, self.pad_out))
        act_bytes = 4 * tb * (pin0 + sum(self.pad_out))
        vmem_limit = int(min(64 << 20, max(8 << 20, 2 * (param_bytes + act_bytes) + (2 << 20))))
        flops = 2 * batch_pad * sum(pi * po for pi, po in zip(self.pad_in, self.pad_out))
        bytes_accessed = param_bytes + 4 * batch_pad * (pin0 + pout_last)

        in_specs = [pl.BlockSpec((tb, pin0), lambda i: (i, 0))]
        args = [x_pad]
        for l in range(n_layers):
            pin, pout = self.pad_in[l], self.pad_out[l]
            # Constant block index across the batch grid -> weights stay VMEM-resident.
            in_specs.append(pl.BlockSpec((pin, pout), lambda i: (0, 0)))
            in_specs.append(pl.BlockSpec((1, pout), lambda i: (0, 0)))
            args.append(self.w_pads[l])
            args.append(self.b_pads[l])

        y_pad = pl.pallas_call(
            functools.partial(_mlp_forward_kernel, n_layers=n_layers),
            out_shape=jax.ShapeDtypeStruct((batch_pad, pout_last), jnp.float32),
            grid=grid,
            in_specs=in_specs,
            out_specs=pl.BlockSpec((tb, pout_last), lambda i: (i, 0)),
            compiler_params=pltpu.CompilerParams(
                dimension_semantics=("parallel",),
                vmem_limit_bytes=vmem_limit,
            ),
            cost_estimate=pl.CostEstimate(
                flops=flops, transcendentals=0, bytes_accessed=bytes_accessed),
        )(*args)

        out = y_pad[:batch, :self.out_features]
        # Reference's MultivariateDiagonalGaussian.log_likelihood() is 0.0 -> constant 0.
        log_variational_posterior = jnp.float32(0.0)
        return out, self.log_prior, log_variational_posterior


def _reference_forward(params, x):
    """Pure-JAX reference for a correctness sanity check."""
    log_prior = jnp.float32(0.0)
    feats = x
    n = len(params)
    for idx, (mu_w, rho_w, mu_b, rho_b) in enumerate(params):
        w = mu_w + jax.nn.softplus(rho_w)
        b = mu_b + jax.nn.softplus(rho_b)
        y = feats @ w.T + b
        if idx < n - 1:
            y = jnp.maximum(y, 0.0)
        feats = y
        log_prior = log_prior + jnp.sum(-0.5 * w * w - _HALF_LOG_2PI) \
                              + jnp.sum(-0.5 * b * b - _HALF_LOG_2PI)
    return feats, log_prior, jnp.float32(0.0)


if __name__ == "__main__":
    key = jax.random.PRNGKey(0)
    k_params, k_x = jax.random.split(key)

    batch, in_features, hidden, out_features = 2, 16, (32,), 10
    net = BayesNetPallas(in_features, hidden, out_features, k_params)
    x = jax.random.normal(k_x, (batch, in_features), jnp.float32)

    out, log_prior, log_var_post = net.forward(x)
    out = jax.block_until_ready(out)
    log_prior = jax.block_until_ready(log_prior)
    log_var_post = jax.block_until_ready(log_var_post)

    ref_out, ref_lp, ref_lvp = _reference_forward(net.params, x)
    assert out.shape == (batch, out_features)
    assert jnp.allclose(out, ref_out, atol=1e-5, rtol=1e-5)
    assert jnp.allclose(log_prior, ref_lp, atol=1e-4, rtol=1e-5)
    assert jnp.allclose(log_var_post, ref_lvp)

    print("KERNEL_OK")
</pallas_src>

<mosaic_0001>
module attributes {stable_mosaic.version = 11 : i64} {
  func.func @_prepare_layer_kernel(%arg0: memref<128x128xf32, #tpu.memory_space<vmem>>, %arg1: memref<128x128xf32, #tpu.memory_space<vmem>>, %arg2: memref<1x128xf32, #tpu.memory_space<vmem>>, %arg3: memref<1x128xf32, #tpu.memory_space<vmem>>, %arg4: memref<128x128xf32, #tpu.memory_space<vmem>>, %arg5: memref<1x128xf32, #tpu.memory_space<vmem>>, %arg6: memref<1x1xf32, #tpu.memory_space<smem>>) attributes {dimension_semantics = [], scalar_prefetch = 0 : i64, scratch_operands = 0 : i64, tpu.core_type = #tpu.core_type<tc>} {
    %c0 = arith.constant 0 : index
    %c0_0 = arith.constant 0 : index
    %0 = vector.load %arg0[%c0, %c0_0] : memref<128x128xf32, #tpu.memory_space<vmem>>, vector<128x128xf32>
    %c0_1 = arith.constant 0 : index
    %c0_2 = arith.constant 0 : index
    %1 = vector.load %arg1[%c0_1, %c0_2] : memref<128x128xf32, #tpu.memory_space<vmem>>, vector<128x128xf32>
    %cst = arith.constant 0.000000e+00 : f32
    %2 = vector.broadcast %cst : f32 to vector<128x128xf32>
    %3 = arith.maximumf %1, %2 : vector<128x128xf32>
    %4 = vector.broadcast %cst : f32 to vector<128x128xf32>
    %5 = arith.subf %1, %4 : vector<128x128xf32>
    %6 = arith.cmpf one, %5, %5 : vector<128x128xf32>
    %7 = vector.broadcast %cst : f32 to vector<128x128xf32>
    %8 = arith.addf %1, %7 : vector<128x128xf32>
    %9 = math.absf %5 : vector<128x128xf32>
    %cst_3 = arith.constant 0.000000e+00 : f32
    %10 = vector.broadcast %cst_3 : f32 to vector<128x128xf32>
    %11 = arith.subf %10, %9 : vector<128x128xf32>
    %12 = math.exp %11 : vector<128x128xf32>
    %13 = math.log1p %12 : vector<128x128xf32>
    %14 = arith.addf %3, %13 : vector<128x128xf32>
    %15 = arith.select %6, %8, %14 : vector<128x128xi1>, vector<128x128xf32>
    %16 = arith.addf %0, %15 : vector<128x128xf32>
    %c0_4 = arith.constant 0 : index
    %c0_5 = arith.constant 0 : index
    %17 = vector.load %arg2[%c0_4, %c0_5] : memref<1x128xf32, #tpu.memory_space<vmem>>, vector<1x128xf32>
    %c0_6 = arith.constant 0 : index
    %c0_7 = arith.constant 0 : index
    %18 = vector.load %arg3[%c0_6, %c0_7] : memref<1x128xf32, #tpu.memory_space<vmem>>, vector<1x128xf32>
    %cst_8 = arith.constant 0.000000e+00 : f32
    %19 = vector.broadcast %cst_8 : f32 to vector<1x128xf32>
    %20 = arith.maximumf %18, %19 : vector<1x128xf32>
    %21 = vector.broadcast %cst_8 : f32 to vector<1x128xf32>
    %22 = arith.subf %18, %21 : vector<1x128xf32>
    %23 = arith.cmpf one, %22, %22 : vector<1x128xf32>
    %24 = vector.broadcast %cst_8 : f32 to vector<1x128xf32>
    %25 = arith.addf %18, %24 : vector<1x128xf32>
    %26 = math.absf %22 : vector<1x128xf32>
    %cst_9 = arith.constant 0.000000e+00 : f32
    %27 = vector.broadcast %cst_9 : f32 to vector<1x128xf32>
    %28 = arith.subf %27, %26 : vector<1x128xf32>
    %29 = math.exp %28 : vector<1x128xf32>
    %30 = math.log1p %29 : vector<1x128xf32>
    %31 = arith.addf %20, %30 : vector<1x128xf32>
    %32 = arith.select %23, %25, %31 : vector<1x128xi1>, vector<1x128xf32>
    %33 = arith.addf %17, %32 : vector<1x128xf32>
    %c0_10 = arith.constant 0 : index
    %c0_11 = arith.constant 0 : index
    %34 = vector.load %arg4[%c0_10, %c0_11] : memref<128x128xf32, #tpu.memory_space<vmem>>, vector<128x128xf32>
    tpu.vector_store %arg4[%c0_10, %c0_11], %16 {strides = array<i32>} : memref<128x128xf32, #tpu.memory_space<vmem>>, vector<128x128xf32>,
    %c0_12 = arith.constant 0 : index
    %c0_13 = arith.constant 0 : index
    %35 = vector.load %arg5[%c0_12, %c0_13] : memref<1x128xf32, #tpu.memory_space<vmem>>, vector<1x128xf32>
    tpu.vector_store %arg5[%c0_12, %c0_13], %33 {strides = array<i32>} : memref<1x128xf32, #tpu.memory_space<vmem>>, vector<1x128xf32>,
    %36 = arith.mulf %16, %16 : vector<128x128xf32>
    %37 = vector.shape_cast %36 : vector<128x128xf32> to vector<1x128x128xf32>
    %cst_14 = arith.constant dense<0.000000e+00> : vector<1xf32>
    %38 = vector.multi_reduction <add>, %37, %cst_14 [1, 2] : vector<1x128x128xf32> to vector<1xf32>
    %39 = vector.shape_cast %38 : vector<1xf32> to vector<1x1x1xf32>
    %40 = vector.extract %39[0, 0, 0] : f32 from vector<1x1x1xf32>
    %41 = arith.mulf %33, %33 : vector<1x128xf32>
    %42 = vector.shape_cast %41 : vector<1x128xf32> to vector<1x1x128xf32>
    %cst_15 = arith.constant dense<0.000000e+00> : vector<1xf32>
    %43 = vector.multi_reduction <add>, %42, %cst_15 [1, 2] : vector<1x1x128xf32> to vector<1xf32>
    %44 = vector.shape_cast %43 : vector<1xf32> to vector<1x1x1xf32>
    %45 = vector.extract %44[0, 0, 0] : f32 from vector<1x1x1xf32>
    %46 = arith.addf %40, %45 : f32
    %cst_16 = arith.constant -5.000000e-01 : f32
    %47 = arith.mulf %cst_16, %46 : f32
    %cst_17 = arith.constant 499.902557 : f32
    %48 = arith.subf %47, %cst_17 : f32
    %c0_18 = arith.constant 0 : index
    %c0_19 = arith.constant 0 : index
    %49 = memref.load %arg6[%c0_18, %c0_19] : memref<1x1xf32, #tpu.memory_space<smem>>
    memref.store %48, %arg6[%c0_18, %c0_19] : memref<1x1xf32, #tpu.memory_space<smem>>
    return
  }
}

</mosaic_0001>

<bundles_post_ra>
// kernel: tpu_custom_call.1
= control target key start
LH: loop header
LB: loop body
LE: loop exit
PB: predicated region body
PF: predicated region fallthrough
CT: control target
= control target key end

     0   :  { %12 = vsyncpa [#allocation3], 0  ;;  %s1223_s0 = inlined_call_operand.hbm [shape: f32[128,128], index: 0, kind: input, shape index: {}]   ;;  %s1224_s1 = inlined_call_operand.hbm [shape: f32[128,128], index: 1, kind: input, shape index: {}]   ;;  %s1225_s2 = inlined_call_operand.vmem [shape: f32[1,128], index: 2, kind: input, shape index: {}]   ;;  %s1226_s3 = inlined_call_operand.vmem [shape: f32[1,128], index: 3, kind: input, shape index: {}]   ;;  %s1227_s4 = inlined_call_operand.hbm [shape: f32[128,128], index: 4, kind: output, shape index: {0}]   ;;  %s1228_s5 = inlined_call_operand.hbm [shape: f32[1,128], index: 5, kind: output, shape index: {1}]   ;;  %s1229_s6 = inlined_call_operand.hbm [shape: f32[1,1], index: 6, kind: output, shape index: {2}]  }
   0x1   :  { %13 = vsyncpa [#allocation7], 0 }
   0x2   :  { %14 = vsyncpa [#allocation4], 0 }
   0x3   :  { %15 = vsyncpa [#allocation10], 0 }
   0x4   :  { %16 = vsyncpa [#allocation5], 0  ;;  %s705_s21 = smov [#allocation2]  }
   0x5   :  { %s22_s22 = sshll.u32 %s705_s21, 4  ;;  %s23_s22 = int_to_ptr.vmem [resolvable:$true] %s22_s22 }
   0x6   :  { %s615_s23 = scalar_lea.vmem %s23_s22, 2048  ;;  %p620_p1 = scmp.lt.s32.totalorder %s23_s22, %s23_s22 }
   0x7   :  { %p616_p0 = scmp.ne.s32.totalorder %s23_s22, %s615_s23  ;;  %p621_p2 = scmp.lt.s32.totalorder %s615_s23, %s615_s23 }
   0x9   :  { %p622_p3 = por %p621_p2, %p620_p1 }
   0xb   :  { %p623_p4 = pnand %p622_p3, %p616_p0 }
   0xd   :  { %626 = shalt.err (!%p623_p4)
}
   0xe   :  { %s706_s24 = smov 128   ;;  %s707_s25 = smov 8  }
   0xf   :  { %28 = dma.hbm_to_vmem [thread:$0]  %s1223_s0, 2048, %s23_s22, [#allocation3], %s706_s24, %s706_s24, %s707_s25  }
  0x10   :  { %s708_s28 = smov [#allocation6]  }
  0x11   :  { %s34_s29 = sshll.u32 %s708_s28, 4  ;;  %s35_s29 = int_to_ptr.vmem [resolvable:$true] %s34_s29 }
  0x12   :  { %s635_s30 = scalar_lea.vmem %s35_s29, 2048  ;;  %p640_p6 = scmp.lt.s32.totalorder %s35_s29, %s35_s29 }
  0x13   :  { %p636_p5 = scmp.ne.s32.totalorder %s35_s29, %s635_s30  ;;  %p641_p7 = scmp.lt.s32.totalorder %s635_s30, %s635_s30 }
  0x15   :  { %p642_p8 = por %p641_p7, %p640_p6 }
  0x17   :  { %p643_p9 = pnand %p642_p8, %p636_p5 }
  0x19   :  { %646 = shalt.err (!%p643_p9)
}
  0x1a   :  { %40 = dma.hbm_to_vmem [thread:$0]  %s1224_s1, 2048, %s35_s29, [#allocation7], %s706_s24, %s706_s24, %s707_s25  }
  0x1b   :  { %695 = dma.done.wait [#allocation3], 2048  }
  0x1c   :  { %696 = vsyncadd [#allocation3], 4294965248 }
  0x1d   :  { %697 = dma.done.wait [#allocation7], 2048  }
  0x1e   :  { %698 = vsyncadd [#allocation7], 4294965248  ;;  %v759_v0 = vld [vmem:[#allocation6] sm:$0xff]  ;;  %v761_v1 = vld [vmem:[#allocation6 + $0x8] sm:$0xff]  ;;  %s709_s10 = smov [#allocation8]   ;;  %s710_s12 = smov [#allocation9]  }
  0x1f   :  { %v763_v2 = vld [vmem:[#allocation6 + $0x10] sm:$0xff]  ;;  %v765_v3 = vld [vmem:[#allocation6 + $0x18] sm:$0xff]  ;;  %v767_v4 = vld [vmem:[#allocation6 + $0x20] sm:$0xff]  ;;  %v131_v5 = vand.u32 2147483647, %v759_v0  ;;  %vm99_vm10 = vcmp.ne.f32.partialorder %v759_v0, %v759_v0  ;;  %vm100_vm12 = vcmp.ne.f32.partialorder %v761_v1, %v761_v1  ;;  %s487_s11 = sshll.u32 %s709_s10, 4  ;;  %s488_s11 = int_to_ptr.vmem [resolvable:$true] %s487_s11 }
  0x20   :  { %v132_v6 = vand.u32 2147483647, %v761_v1  ;;  %v771_v7 = vld [vmem:[#allocation6 + $0x28] sm:$0xff]  ;;  %v133_v8 = vand.u32 2147483647, %v763_v2  ;;  %v775_v10 = vld [vmem:[#allocation6 + $0x30] sm:$0xff]  ;;  %vm101_vm13 = vcmp.ne.f32.partialorder %v763_v2, %v763_v2  ;;  %p652_p11 = scmp.lt.s32.totalorder %s488_s11, %s488_s11 }
  0x21   :  { %v134_v9 = vand.u32 2147483647, %v765_v3  ;;  %v135_v11 = vand.u32 2147483647, %v767_v4  ;;  %v778_v12 = vld [vmem:[#allocation6 + $0x38] sm:$0xff]  ;;  %v780_v13 = vld [vmem:[#allocation6 + $0x40] sm:$0xff] }
  0x22   :  { %v782_v14 = vld [vmem:[#allocation6 + $0x48] sm:$0xff]  ;;  %v136_v15 = vand.u32 2147483647, %v771_v7  ;;  %v147_v16 = vsub.f32 0.0, %v131_v5  ;;  %v148_v17 = vsub.f32 0.0, %v132_v6  ;;  %v149_v19 = vsub.f32 0.0, %v133_v8 }
  0x23   :  { %v137_v18 = vand.u32 2147483647, %v775_v10  ;;  %v150_v20 = vsub.f32 0.0, %v134_v9  ;;  %v786_v21 = vld [vmem:[#allocation6 + $0x50] sm:$0xff]  ;;  %v151_v22 = vsub.f32 0.0, %v135_v11  ;;  %v791_v26 = vld [vmem:[#allocation6 + $0x58] sm:$0xff] }
  0x24   :  { %v138_v23 = vand.u32 2147483647, %v778_v12  ;;  %v139_v24 = vand.u32 2147483647, %v780_v13  ;;  %v140_v25 = vand.u32 2147483647, %v782_v14  ;;  %vm109_vm14 = vcmp.ne.f32.partialorder %v786_v21, %v786_v21 }
  0x25   :  { %v152_v27 = vsub.f32 0.0, %v136_v15  ;;  %v163_v28 = vmul.f32 1.442695, %v147_v16  ;;  %v165_v29 = vmul.f32 1.442695, %v148_v17  ;;  %v793_v30 = vld [vmem:[#allocation6 + $0x60] sm:$0xff] }
  0x26   :  { %v153_v31 = vsub.f32 0.0, %v137_v18  ;;  %v167_v32 = vmul.f32 1.442695, %v149_v19  ;;  %v169_v33 = vmul.f32 1.442695, %v150_v20  ;;  %v795_v34 = vld [vmem:[#allocation6 + $0x68] sm:$0xff] }
  0x27   :  { %v141_v35 = vand.u32 2147483647, %v786_v21  ;;  %539 = vpow2.f32 %v163_v28  ;;  %v171_v36 = vmul.f32 1.442695, %v151_v22  ;;  %v142_v37 = vand.u32 2147483647, %v791_v26 }
  0x28   :  { %v154_v38 = vsub.f32 0.0, %v138_v23  ;;  %541 = vpow2.f32 %v165_v29  ;;  %v143_v39 = vand.u32 2147483647, %v793_v30  ;;  %v155_v40 = vsub.f32 0.0, %v139_v24  ;;  %v801_v45 = vld [vmem:[#allocation6 + $0x70] sm:$0xff]  ;;  %v803_v49 = vld [vmem:[#allocation6 + $0x78] sm:$0xff] }
  0x29   :  { %543 = vpow2.f32 %v167_v32  ;;  %v173_v41 = vmul.f32 1.442695, %v152_v27  ;;  %v144_v42 = vand.u32 2147483647, %v795_v34  ;;  %v156_v43 = vsub.f32 0.0, %v140_v25  ;;  %s500_s13 = sshll.u32 %s710_s12, 4  ;;  %s501_s13 = int_to_ptr.vmem [resolvable:$true] %s500_s13 }
  0x2a   :  { %545 = vpow2.f32 %v169_v33  ;;  %v175_v44 = vmul.f32 1.442695, %v153_v31  ;;  %v157_v46 = vsub.f32 0.0, %v141_v35  ;;  %v158_v47 = vsub.f32 0.0, %v142_v37  ;;  %v821_v23 = vld [vmem:[%s1226_s3] sm:$0x1] }
  0x2b   :  { %547 = vpow2.f32 %v171_v36  ;;  %v177_v48 = vmul.f32 1.442695, %v154_v38  ;;  %v159_v50 = vsub.f32 0.0, %v143_v39  ;;  %v179_v51 = vmul.f32 1.442695, %v155_v40  ;;  %1232 = vst [vmem:[#allocation17_spill] sm:$0xff] %v821_v23 }
  0x2c   :  { %549 = vpow2.f32 %v173_v41  ;;  %v145_v52 = vand.u32 2147483647, %v801_v45  ;;  %v160_v53 = vsub.f32 0.0, %v144_v42  ;;  %v181_v54 = vmul.f32 1.442695, %v156_v43  ;;  %s647_s14 = scalar_lea.vmem %s488_s11, 2048 }
  0x2d   :  { %551 = vpow2.f32 %v175_v44  ;;  %v183_v55 = vmul.f32 1.442695, %v157_v46  ;;  %v146_v57 = vand.u32 2147483647, %v803_v49  ;;  %v185_v58 = vmul.f32 1.442695, %v158_v47  ;;  %p648_p10 = scmp.ne.s32.totalorder %s488_s11, %s647_s14  ;;  %p653_p12 = scmp.lt.s32.totalorder %s647_s14, %s647_s14 }
  0x2e   :  { %553 = vpow2.f32 %v177_v48  ;;  %v187_v61 = vmul.f32 1.442695, %v159_v50  ;;  %v161_v63 = vsub.f32 0.0, %v145_v52  ;;  %v189_v5 = vmul.f32 1.442695, %v160_v53 }
  0x2f   :  { %555 = vpow2.f32 %v179_v51  ;;  %v162_v17 = vsub.f32 0.0, %v146_v57  ;;  %v392_v38 = vand.u32 2147483647, %v821_v23  ;;  %p654_p13 = por %p653_p12, %p652_p11 }
  0x30   :  { %557 = vpow2.f32 %v181_v54  ;;  %v191_v25 = vmul.f32 1.442695, %v161_v63 }
  0x31   :  { %559 = vpow2.f32 %v183_v55  ;;  %v193_v36 = vmul.f32 1.442695, %v162_v17  ;;  %v840_v54 = vsub.f32 0.0, %v392_v38  ;;  %p655_p0 = pnand %p654_p13, %p648_p10 }
  0x32   :  { %561 = vpow2.f32 %v185_v58 }
  0x33   :  { %563 = vpow2.f32 %v187_v61 }
  0x34   :  { %v540_v11 = vpop.eup %539  ;;  %565 = vpow2.f32 %v189_v5 }
  0x35   :  { %v542_v18 = vpop.eup %541  ;;  %v195_v22 = vadd.f32 1.0, %v540_v11  ;;  %v198_v27 = vmul.f32 -0.5, %v540_v11  ;;  %v201_v46 = vand.u32 2147483647, %v540_v11 }
  0x36   :  { %v544_v24 = vpop.eup %543  ;;  %v204_v28 = vadd.f32 1.0, %v542_v18  ;;  %v207_v32 = vmul.f32 -0.5, %v542_v18  ;;  %v210_v57 = vand.u32 2147483647, %v542_v18 }
  0x37   :  { %v823_v29 = vpop.eup %545  ;;  %567 = vlog2.f32 %v195_v22  ;;  %v213_v33 = vadd.f32 1.0, %v544_v24  ;;  %v216_v37 = vmul.f32 -0.5, %v544_v24  ;;  %v199_v44 = vadd.f32 1.0, %v198_v27 }
  0x38   :  { %v826_v35 = vpop.eup %547  ;;  %569 = vlog2.f32 %v204_v28  ;;  %v222_v41 = vadd.f32 1.0, %v823_v29  ;;  %v208_v48 = vadd.f32 1.0, %v207_v32  ;;  %v225_v50 = vmul.f32 -0.5, %v823_v29 }
  0x39   :  { %571 = vlog2.f32 %v213_v33  ;;  %v832_v42 = vpop.eup %549  ;;  %v231_v51 = vadd.f32 1.0, %v826_v35  ;;  %v217_v53 = vadd.f32 1.0, %v216_v37  ;;  %v234_v58 = vmul.f32 -0.5, %v826_v35 }
  0x3a   :  { %573 = vpow2.f32 %v191_v25  ;;  %v835_v47 = vpop.eup %551  ;;  %v240_v61 = vadd.f32 1.0, %v832_v42  ;;  %v846_v5 = vmul.f32 %v540_v11, %v199_v44  ;;  %v219_v17 = vand.u32 2147483647, %v544_v24 }
  0x3b   :  { %575 = vlog2.f32 %v222_v41  ;;  %v554_v55 = vpop.eup %553  ;;  %v243_v22 = vmul.f32 -0.5, %v832_v42  ;;  %v249_v25 = vadd.f32 1.0, %v835_v47  ;;  %vm852_vm0 = vcmp.lt.f32.partialorder %v201_v46, 0.0004427343 }
  0x3c   :  { %577 = vpow2.f32 %v193_v36  ;;  %v844_v63 = vpop.eup %555  ;;  %v856_v32 = vmul.f32 %v542_v18, %v208_v48  ;;  %v226_v33 = vadd.f32 1.0, %v225_v50  ;;  %v252_v36 = vmul.f32 -0.5, %v835_v47 }
  0x3d   :  { %579 = vlog2.f32 %v231_v51  ;;  %v850_v27 = vpop.eup %557  ;;  %v861_v11 = vmul.f32 %v544_v24, %v217_v53  ;;  %v228_v38 = vand.u32 2147483647, %v823_v29  ;;  %v258_v41 = vadd.f32 1.0, %v554_v55 }
  0x3e   :  { %581 = vlog2.f32 %v240_v61  ;;  %v859_v37 = vpop.eup %559  ;;  %vm866_vm1 = vcmp.lt.f32.partialorder %v210_v57, 0.0004427343  ;;  %v235_v18 = vadd.f32 1.0, %v234_v58  ;;  %v237_v48 = vand.u32 2147483647, %v826_v35 }
  0x3f   :  { %583 = vlog2.f32 %v249_v25  ;;  %v864_v44 = vpop.eup %561  ;;  %v246_v50 = vand.u32 2147483647, %v832_v42  ;;  %v261_v51 = vmul.f32 -0.5, %v554_v55  ;;  %vm874_vm2 = vcmp.lt.f32.partialorder %v219_v17, 0.0004427343 }
  0x40   :  { %v872_v61 = vpop.eup %563  ;;  %v244_v53 = vadd.f32 1.0, %v243_v22  ;;  %585 = vlog2.f32 %v258_v41  ;;  %v267_v25 = vadd.f32 1.0, %v844_v63  ;;  %v270_v57 = vmul.f32 -0.5, %v844_v63 }
  0x41   :  { %v880_v52 = vpop.eup %565  ;;  %v883_v58 = vmul.f32 %v823_v29, %v226_v33  ;;  %v253_v43 = vadd.f32 1.0, %v252_v36  ;;  %v255_v40 = vand.u32 2147483647, %v835_v47  ;;  %v264_v39 = vand.u32 2147483647, %v554_v55 }
  0x42   :  { %vm886_vm3 = vcmp.lt.f32.partialorder %v228_v38, 0.0004427343  ;;  %v262_v22 = vadd.f32 1.0, %v261_v51  ;;  %587 = vlog2.f32 %v267_v25  ;;  %v271_v41 = vadd.f32 1.0, %v270_v57 }
  0x43   :  { %v276_v20 = vadd.f32 1.0, %v850_v27  ;;  %v892_v16 = vmul.f32 %v826_v35, %v235_v18  ;;  %vm894_vm4 = vcmp.lt.f32.partialorder %v237_v48, 0.0004427343  ;;  %vm898_vm5 = vcmp.lt.f32.partialorder %v246_v50, 0.0004427343 }
  0x44   :  { %v568_v31 = vpop.eup %567  ;;  %v279_v36 = vmul.f32 -0.5, %v850_v27  ;;  %v906_v25 = vmul.f32 %v832_v42, %v244_v53  ;;  %v273_v57 = vand.u32 2147483647, %v844_v63  ;;  %v912_v18 = vmul.f32 %v835_v47, %v253_v43 }
  0x45   :  { %v570_v19 = vpop.eup %569  ;;  %v903_v51 = vmul.f32 0.6931472, %v568_v31  ;;  %589 = vlog2.f32 %v276_v20  ;;  %vm914_vm6 = vcmp.lt.f32.partialorder %v255_v40, 0.0004427343  ;;  %v282_v50 = vand.u32 2147483647, %v850_v27 }
  0x46   :  { %v572_v38 = vpop.eup %571  ;;  %v285_v31 = vadd.f32 1.0, %v859_v37  ;;  %v920_v9 = vmul.f32 0.6931472, %v570_v19  ;;  %v922_v42 = vmul.f32 %v554_v55, %v262_v22  ;;  %vm924_vm7 = vcmp.lt.f32.partialorder %v264_v39, 0.0004427343 }
  0x47   :  { %v909_v35 = vpop.eup %573  ;;  %v929_v43 = vmul.f32 %v844_v63, %v271_v41  ;;  %v288_v40 = vmul.f32 -0.5, %v859_v37  ;;  %v934_v53 = vmul.f32 0.6931472, %v572_v38  ;;  %v280_v8 = vadd.f32 1.0, %v279_v36 }
  0x48   :  { %v576_v15 = vpop.eup %575  ;;  %591 = vlog2.f32 %v285_v31  ;;  %v294_v19 = vadd.f32 1.0, %v864_v44  ;;  %vm943_vm8 = vcmp.lt.f32.partialorder %v273_v57, 0.0004427343  ;;  %v291_v22 = vand.u32 2147483647, %v859_v37 }
  0x49   :  { %v932_v47 = vpop.eup %577  ;;  %v941_v55 = vmul.f32 0.6931472, %v576_v15  ;;  %v297_v41 = vmul.f32 -0.5, %v864_v44  ;;  %vm951_vm9 = vcmp.lt.f32.partialorder %v282_v50, 0.0004427343  ;;  %v289_v31 = vadd.f32 1.0, %v288_v40 }
  0x4a   :  { %v580_v6 = vpop.eup %579  ;;  %593 = vlog2.f32 %v294_v19  ;;  %v303_v62 = vadd.f32 1.0, %v872_v61  ;;  %v300_v59 = vand.u32 2147483647, %v864_v44  ;;  %v221_v50 = vsel %vm874_vm2, %v861_v11, %v934_v53 }
  0x4b   :  { %v949_v36 = vmul.f32 0.6931472, %v580_v6  ;;  %v582_v15 = vpop.eup %581  ;;  %v298_v60 = vadd.f32 1.0, %v297_v41  ;;  %v306_v6 = vmul.f32 -0.5, %v872_v61  ;;  %v969_v19 = vmul.f32 %v850_v27, %v280_v8 }
  0x4c   :  { %v584_v39 = vpop.eup %583  ;;  %v966_v40 = vmul.f32 0.6931472, %v582_v15  ;;  %595 = vlog2.f32 %v303_v62  ;;  %vm975_vm11 = vcmp.lt.f32.partialorder %v291_v22, 0.0004427343  ;;  %v309_v23 = vand.u32 2147483647, %v872_v61 }
  0x4d   :  { %v973_v41 = vmul.f32 0.6931472, %v584_v39  ;;  %v307_v56 = vadd.f32 1.0, %v306_v6  ;;  %v312_v11 = vadd.f32 1.0, %v880_v52  ;;  %v586_v24 = vpop.eup %585  ;;  %v230_v62 = vsel %vm886_vm3, %v883_v58, %v941_v55 }
  0x4e   :  { %v239_v8 = vsel %vm894_vm4, %v892_v16, %v949_v36  ;;  %v996_v27 = vmul.f32 %v859_v37, %v289_v31  ;;  %v315_v53 = vmul.f32 -0.5, %v880_v52  ;;  %v248_v58 = vsel %vm898_vm5, %v906_v25, %v966_v40 }
  0x4f   :  { %v260_v17 = vmul.f32 0.6931472, %v586_v24  ;;  %v1008_v29 = vmul.f32 %v864_v44, %v298_v60  ;;  %vm1010_vm3 = vcmp.lt.f32.partialorder %v300_v59, 0.0004427343  ;;  %597 = vlog2.f32 %v312_v11  ;;  %v588_v37 = vpop.eup %587 }
  0x50   :  { %vm105_vm4 = vcmp.ne.f32.partialorder %v775_v10, %v775_v10  ;;  %vm106_vm2 = vcmp.ne.f32.partialorder %v778_v12, %v778_v12  ;;  %v316_v33 = vadd.f32 1.0, %v315_v53  ;;  %v318_v25 = vand.u32 2147483647, %v880_v52 }
  0x51   :  { %v321_v60 = vadd.f32 1.0, %v909_v35  ;;  %v324_v59 = vmul.f32 -0.5, %v909_v35  ;;  %v257_v44 = vsel %vm914_vm6, %v912_v18, %v973_v41  ;;  %v269_v39 = vmul.f32 0.6931472, %v588_v37 }
  0x52   :  { %v1032_v55 = vmul.f32 %v872_v61, %v307_v56  ;;  %vm1034_vm15 = vcmp.lt.f32.partialorder %v309_v23, 0.0004427343  ;;  %v330_v36 = vadd.f32 1.0, %v932_v47  ;;  %v590_v31 = vpop.eup %589  ;;  %v266_v15 = vsel %vm924_vm7, %v922_v42, %v260_v17 }
  0x53   :  { %599 = vlog2.f32 %v321_v60  ;;  %v325_v18 = vadd.f32 1.0, %v324_v59  ;;  %v333_v48 = vmul.f32 -0.5, %v932_v47  ;;  %v278_v56 = vmul.f32 0.6931472, %v590_v31 }
  0x54   :  { %v1046_v23 = vmul.f32 %v880_v52, %v316_v33  ;;  %v327_v61 = vand.u32 2147483647, %v909_v35  ;;  %601 = vlog2.f32 %v330_v36  ;;  %vm111_vm6 = vcmp.ne.f32.partialorder %v793_v30, %v793_v30 }
  0x55   :  { %v275_v6 = vsel %vm943_vm8, %v929_v43, %v269_v39  ;;  %vm1054_vm5 = vcmp.lt.f32.partialorder %v318_v25, 0.0004427343  ;;  %v334_v20 = vadd.f32 1.0, %v333_v48  ;;  %v336_v40 = vand.u32 2147483647, %v932_v47  ;;  %v592_v24 = vpop.eup %591 }
  0x56   :  { %v1261_v52 = vmax.f32 %v759_v0, 0.0  ;;  %v1262_v41 = vsel %vm852_vm0, %v846_v5, %v903_v51  ;;  %v284_v43 = vsel %vm951_vm9, %v969_v19, %v278_v56  ;;  %v1263_v63 = vmax.f32 %v761_v1, 0.0  ;;  %v51_v56 = vld [vmem:[#allocation2] sm:$0xff] }
  0x57   :  { %v1264_v53 = vsel %vm866_vm1, %v856_v32, %v920_v9  ;;  %v1265_v37 = vmax.f32 %v763_v2, 0.0  ;;  %v1266_v33 = vmax.f32 %v765_v3, 0.0  ;;  %v287_v51 = vmul.f32 0.6931472, %v592_v24  ;;  %v594_v60 = vpop.eup %593  ;;  %v55_v24 = vld [vmem:[#allocation2 + $0x20] sm:$0xff] }
  0x58   :  { %v339_v11 = vadd.f32 %v1262_v41, %v1261_v52  ;;  %v340_v17 = vadd.f32 %v1264_v53, %v1263_v63  ;;  %v1081_v25 = vmul.f32 %v909_v35, %v325_v18  ;;  %v1084_v38 = vmul.f32 %v932_v47, %v334_v20  ;;  %v52_v20 = vld [vmem:[#allocation2 + $0x8] sm:$0xff]  ;;  %v57_v53 = vld [vmem:[#allocation2 + $0x30] sm:$0xff] }
  0x59   :  { %v341_v28 = vadd.f32 %v221_v50, %v1265_v37  ;;  %v342_v5 = vadd.f32 %v230_v62, %v1266_v33  ;;  %v1267_v19 = vmax.f32 %v767_v4, 0.0  ;;  %vm112_vm0 = vcmp.ne.f32.partialorder %v795_v34, %v795_v34  ;;  %v59_v33 = vld [vmem:[#allocation2 + $0x40] sm:$0xff] }
  0x5a   :  { %vm1090_vm1 = vcmp.lt.f32.partialorder %v327_v61, 0.0004427343  ;;  %v1270_v32 = vmax.f32 %v771_v7, 0.0  ;;  %v1271_v35 = vmax.f32 %v775_v10, 0.0  ;;  %v1272_v47 = vmax.f32 %v778_v12, 0.0 }
  0x5b   :  { %v343_v46 = vadd.f32 %v239_v8, %v1267_v19  ;;  %v1273_v39 = vmax.f32 %v780_v13, 0.0  ;;  %v293_v36 = vsel %vm975_vm11, %v996_v27, %v287_v51  ;;  %v296_v31 = vmul.f32 0.6931472, %v594_v60  ;;  %v63_v60 = vld [vmem:[#allocation2 + $0x60] sm:$0xff] }
  0x5c   :  { %v344_v50 = vadd.f32 %v248_v58, %v1270_v32  ;;  %v345_v62 = vadd.f32 %v257_v44, %v1271_v35  ;;  %v346_v59 = vadd.f32 %v266_v15, %v1272_v47  ;;  %vm1105_vm7 = vcmp.lt.f32.partialorder %v336_v40, 0.0004427343  ;;  %v596_v15 = vpop.eup %595  ;;  %v53_v40 = vld [vmem:[#allocation2 + $0x10] sm:$0xff] }
  0x5d   :  { %v347_v8 = vadd.f32 %v275_v6, %v1273_v39  ;;  %v1276_v58 = vmax.f32 %v782_v14, 0.0  ;;  %v355_v44 = vsel %vm99_vm10, %v759_v0, %v339_v11  ;;  %v1277_v61 = vmax.f32 %v786_v21, 0.0  ;;  %v54_v11 = vld [vmem:[#allocation2 + $0x18] sm:$0xff]  ;;  %v598_v16 = vpop.eup %597 }
  0x5e   :  { %v356_v57 = vsel %vm100_vm12, %v761_v1, %v340_v17  ;;  %v357_v27 = vsel %vm101_vm13, %v763_v2, %v341_v28  ;;  %vm1278_vm8 = vcmp.ne.f32.partialorder %v765_v3, %v765_v3  ;;  %v302_v52 = vsel %vm1010_vm3, %v1008_v29, %v296_v31  ;;  %v58_v17 = vld [vmem:[#allocation2 + $0x38] sm:$0xff] }
  0x5f   :  { %v348_v48 = vadd.f32 %v284_v43, %v1276_v58  ;;  %v349_v6 = vadd.f32 %v293_v36, %v1277_v61  ;;  %v358_v0 = vsel %vm1278_vm8, %v765_v3, %v342_v5  ;;  %v305_v41 = vmul.f32 0.6931472, %v596_v15  ;;  %v56_v3 = vld [vmem:[#allocation2 + $0x28] sm:$0xff] }
  0x60   :  { %vm1279_vm9 = vcmp.ne.f32.partialorder %v767_v4, %v767_v4  ;;  %vm1280_vm10 = vcmp.ne.f32.partialorder %v771_v7, %v771_v7  ;;  %v1281_v43 = vmax.f32 %v791_v26, 0.0  ;;  %v361_v29 = vsel %vm105_vm4, %v775_v10, %v345_v62  ;;  %v600_v62 = vpop.eup %599  ;;  %v64_v36 = vld [vmem:[#allocation2 + $0x68] sm:$0xff] }
  0x61   :  { %v359_v1 = vsel %vm1279_vm9, %v767_v4, %v343_v46  ;;  %v360_v2 = vsel %vm1280_vm10, %v771_v7, %v344_v50  ;;  %v362_v4 = vsel %vm106_vm2, %v778_v12, %v346_v59  ;;  %vm1282_vm11 = vcmp.ne.f32.partialorder %v780_v13, %v780_v13  ;;  %v61_v46 = vld [vmem:[#allocation2 + $0x50] sm:$0xff] }
  0x62   :  { %v350_v63 = vadd.f32 %v302_v52, %v1281_v43  ;;  %v363_v7 = vsel %vm1282_vm11, %v780_v13, %v347_v8  ;;  %v311_v37 = vsel %vm1034_vm15, %v1032_v55, %v305_v41  ;;  %vm1283_vm12 = vcmp.ne.f32.partialorder %v782_v14, %v782_v14  ;;  %v60_v13 = vld [vmem:[#allocation2 + $0x48] sm:$0xff]  ;;  %v602_v8 = vpop.eup %601 }
  0x63   :  { %v364_v10 = vsel %vm1283_vm12, %v782_v14, %v348_v48  ;;  %v365_v12 = vsel %vm109_vm14, %v786_v21, %v349_v6  ;;  %v371_v28 = vadd.f32 %v355_v44, %v51_v56  ;;  %v314_v5 = vmul.f32 0.6931472, %v598_v16  ;;  %v62_v14 = vld [vmem:[#allocation2 + $0x58] sm:$0xff] }
  0x64   :  { %v1284_v51 = vmax.f32 %v793_v30, 0.0  ;;  %vm1285_vm13 = vcmp.ne.f32.partialorder %v791_v26, %v791_v26  ;;  %v372_v22 = vadd.f32 %v356_v57, %v52_v20  ;;  %v373_v32 = vadd.f32 %v357_v27, %v53_v40  ;;  %v65_v57 = vld [vmem:[#allocation2 + $0x70] sm:$0xff] }
  0x65   :  { %v366_v55 = vsel %vm1285_vm13, %v791_v26, %v350_v63  ;;  %v374_v50 = vadd.f32 %v358_v0, %v54_v11  ;;  %v375_v35 = vadd.f32 %v359_v1, %v55_v24  ;;  %v376_v21 = vadd.f32 %v360_v2, %v56_v3  ;;  %408 = vst [vmem:[#allocation8] sm:$0xff] %v371_v28 }
  0x66   :  { %v351_v19 = vadd.f32 %v311_v37, %v1284_v51  ;;  %v320_v47 = vsel %vm1054_vm5, %v1046_v23, %v314_v5  ;;  %v377_v26 = vadd.f32 %v361_v29, %v57_v53  ;;  %v378_v39 = vadd.f32 %v362_v4, %v58_v17  ;;  %409 = vst [vmem:[#allocation8 + $0x8] sm:$0xff] %v372_v22 }
  0x67   :  { %v323_v31 = vmul.f32 0.6931472, %v600_v62  ;;  %v1286_v58 = vmax.f32 %v795_v34, 0.0  ;;  %v379_v44 = vadd.f32 %v363_v7, %v59_v33  ;;  %v380_v15 = vadd.f32 %v364_v10, %v60_v13  ;;  %410 = vst [vmem:[#allocation8 + $0x10] sm:$0xff] %v373_v32  ;;  %411 = vst [vmem:[#allocation8 + $0x18] sm:$0xff] %v374_v50 }
  0x68   :  { %v367_v59 = vsel %vm111_vm6, %v793_v30, %v351_v19  ;;  %412 = vst [vmem:[#allocation8 + $0x20] sm:$0xff] %v375_v35  ;;  %413 = vst [vmem:[#allocation8 + $0x28] sm:$0xff] %v376_v21  ;;  %v332_v23 = vmul.f32 0.6931472, %v602_v8  ;;  %v381_v42 = vadd.f32 %v365_v12, %v61_v46  ;;  %v382_v56 = vadd.f32 %v366_v55, %v62_v14  ;;  %v1289_v8 = vld [vmem:[#allocation17_spill] sm:$0xff] }
  0x69   :  { %v352_v48 = vadd.f32 %v320_v47, %v1286_v58  ;;  %v383_v61 = vadd.f32 %v367_v59, %v63_v60  ;;  %414 = vst [vmem:[#allocation8 + $0x30] sm:$0xff] %v377_v26  ;;  %415 = vst [vmem:[#allocation8 + $0x38] sm:$0xff] %v378_v39  ;;  %vm113_vm14 = vcmp.ne.f32.partialorder %v801_v45, %v801_v45  ;;  %v1287_v0 = vmax.f32 %v801_v45, 0.0 }
  0x6a   :  { %v329_v30 = vsel %vm1090_vm1, %v1081_v25, %v323_v31  ;;  %416 = vst [vmem:[#allocation8 + $0x40] sm:$0xff] %v379_v44  ;;  %417 = vst [vmem:[#allocation8 + $0x48] sm:$0xff] %v380_v15  ;;  %vm114_vm15 = vcmp.ne.f32.partialorder %v803_v49, %v803_v49  ;;  %v338_v27 = vsel %vm1105_vm7, %v1084_v38, %v332_v23  ;;  %v66_v25 = vld [vmem:[#allocation2 + $0x78] sm:$0xff]  ;;  %v394_v1 = vmul.f32 1.442695, %v840_v54 }
  0x6b   :  { %v368_v6 = vsel %vm112_vm0, %v795_v34, %v352_v48  ;;  %v353_v20 = vadd.f32 %v329_v30, %v1287_v0  ;;  %418 = vst [vmem:[#allocation8 + $0x50] sm:$0xff] %v381_v42  ;;  %419 = vst [vmem:[#allocation8 + $0x58] sm:$0xff] %v382_v56  ;;  %v1288_v34 = vmax.f32 %v803_v49, 0.0  ;;  %v425_v52 = vmul.f32 %v371_v28, %v371_v28  ;;  %v387_v48 = vld [vmem:[%s1225_s2] sm:$0x1] }
  0x6c   :  { %v384_v9 = vadd.f32 %v368_v6, %v64_v36  ;;  %420 = vst [vmem:[#allocation8 + $0x60] sm:$0xff] %v383_v61  ;;  %v426_v41 = vmul.f32 %v372_v22, %v372_v22  ;;  %v427_v11 = vmul.f32 %v373_v32, %v373_v32  ;;  %v428_v3 = vmul.f32 %v374_v50, %v374_v50 }
  0x6d   :  { %v354_v40 = vadd.f32 %v338_v27, %v1288_v34  ;;  %v369_v38 = vsel %vm113_vm14, %v801_v45, %v353_v20  ;;  %603 = vpow2.f32 %v394_v1  ;;  %v429_v63 = vmul.f32 %v375_v35, %v375_v35 }
  0x6e   :  { %421 = vst [vmem:[#allocation8 + $0x68] sm:$0xff] %v384_v9  ;;  %v385_v2 = vadd.f32 %v369_v38, %v65_v57  ;;  %v441_v43 = vadd.f32 %v426_v41, %v425_v52  ;;  %v430_v4 = vmul.f32 %v376_v21, %v376_v21  ;;  %v431_v7 = vmul.f32 %v377_v26, %v377_v26 }
  0x6f   :  { %v370_v18 = vsel %vm114_vm15, %v803_v49, %v354_v40  ;;  %v432_v53 = vmul.f32 %v378_v39, %v378_v39  ;;  %v433_v45 = vmul.f32 %v379_v44, %v379_v44  ;;  %v434_v10 = vmul.f32 %v380_v15, %v380_v15 }
  0x70   :  { %v386_v24 = vadd.f32 %v370_v18, %v66_v25  ;;  %422 = vst [vmem:[#allocation8 + $0x70] sm:$0xff] %v385_v2  ;;  %v442_v29 = vadd.f32 %v441_v43, %v427_v11  ;;  %v435_v28 = vmul.f32 %v381_v42, %v381_v42  ;;  %v436_v5 = vmul.f32 %v382_v56, %v382_v56 }
  0x71   :  { %v437_v19 = vmul.f32 %v383_v61, %v383_v61  ;;  %v438_v22 = vmul.f32 %v384_v9, %v384_v9  ;;  %v439_v60 = vmul.f32 %v385_v2, %v385_v2  ;;  %v389_v36 = vmax.f32 %v1289_v8, 0.0 }
  0x72   :  { %423 = vst [vmem:[#allocation8 + $0x78] sm:$0xff] %v386_v24  ;;  %v443_v54 = vadd.f32 %v442_v29, %v428_v3  ;;  %v440_v50 = vmul.f32 %v386_v24, %v386_v24  ;;  %vm390_vm3 = vcmp.ne.f32.partialorder %v1289_v8, %v1289_v8  ;;  %vm466_vm4 = vcmask 1040384  }
  0x74   :  { %v444_v16 = vadd.f32 %v443_v54, %v429_v63 }
  0x76   :  { %v445_v17 = vadd.f32 %v444_v16, %v430_v4 }
  0x78   :  { %v446_v37 = vadd.f32 %v445_v17, %v431_v7 }
  0x7a   :  { %v447_v49 = vadd.f32 %v446_v37, %v432_v53  ;;  %v604_v12 = vpop.eup %603 }
  0x7b   :  { %v396_v13 = vadd.f32 1.0, %v604_v12  ;;  %v399_v14 = vmul.f32 -0.5, %v604_v12  ;;  %v402_v62 = vand.u32 2147483647, %v604_v12 }
  0x7c   :  { %v448_v33 = vadd.f32 %v447_v49, %v433_v45 }
  0x7d   :  { %605 = vlog2.f32 %v396_v13  ;;  %v400_v21 = vadd.f32 1.0, %v399_v14  ;;  %vm403_vm2 = vcmp.lt.f32.partialorder %v402_v62, 0.0004427343 }
  0x7e   :  { %v449_v51 = vadd.f32 %v448_v33, %v434_v10 }
  0x7f   :  { %v401_v26 = vmul.f32 %v604_v12, %v400_v21 }
  0x80   :  { %v450_v55 = vadd.f32 %v449_v51, %v435_v28 }
  0x82   :  { %v451_v46 = vadd.f32 %v450_v55, %v436_v5 }
  0x84   :  { %v452_v32 = vadd.f32 %v451_v46, %v437_v19 }
  0x86   :  { %v453_v35 = vadd.f32 %v452_v32, %v438_v22 }
  0x88   :  { %v454_v47 = vadd.f32 %v453_v35, %v439_v60 }
  0x8a   :  { %v455_v59 = vadd.f32 %v454_v47, %v440_v50  ;;  %v606_v39 = vpop.eup %605 }
  0x8b   :  { %v398_v31 = vmul.f32 0.6931472, %v606_v39 }
  0x8c   :  { %456 = vadd.xlane.f32.xlu0 %v455_v59 }
  0x8d   :  { %v404_v58 = vsel %vm403_vm2, %v401_v26, %v398_v31 }
  0x8e   :  { %v405_v44 = vadd.f32 %v404_v58, %v389_v36 }
  0x90   :  { %v406_v15 = vsel %vm390_vm3, %v1289_v8, %v405_v44 }
  0x91   :  { %v407_v23 = vadd.f32 %v406_v15, %v387_v48 }
  0x93   :  { %v465_v42 = vmul.f32 %v407_v23, %v407_v23  ;;  %424 = vst [vmem:[#allocation9] sm:$0x1] %v407_v23 }
  0x95   :  { %v467_v56 = vsel %vm466_vm4, %v465_v42, 0.0 }
  0x96   :  { %468 = vadd.xlane.f32.xlu0 %v467_v56 }
  0x97   :  { %658 = shalt.err (!%p655_p0)
}
  0x98   :  { %493 = dma.vmem_to_hbm [thread:$0]  %s488_s11, 2048, %s1227_s4, [#allocation4], %s706_s24, %s706_s24, %s707_s25  }
  0x99   :  { %s667_s16 = scalar_lea.vmem %s501_s13, 16  ;;  %s671_s17 = scalar_lea.vmem %s501_s13, 32 }
  0x9a   :  { %p668_p1 = scmp.ne.s32.totalorder %s501_s13, %s667_s16  ;;  %p672_p2 = scmp.lt.s32.totalorder %s501_s13, %s501_s13 }
  0x9b   :  { %p673_p3 = scmp.lt.s32.totalorder %s671_s17, %s667_s16 }
  0x9d   :  { %p674_p4 = por %p673_p3, %p672_p2 }
  0x9f   :  { %p675_p5 = pnand %p674_p4, %p668_p1 }
  0xa1   :  { %678 = shalt.err (!%p675_p5)
}
  0xa2   :  { %503 = dma.vmem_to_hbm [thread:$0]  %s501_s13, 16, %s1228_s5, [#allocation10]  }
  0xa3   :  { %s711_s23 = smov [#allocation11]  }
 0x115   :  { %v457_v61 = vpop.xlane.xlu0 %456 }
 0x116   :  { %v458_v30 = vrot.slane %v457_v61, 4 }
 0x118   :  { %v459_v6 = vadd.f32 %v458_v30, %v457_v61 }
 0x11a   :  { %v460_v57 = vrot.slane %v459_v6, 2 }
 0x11c   :  { %v461_v27 = vadd.f32 %v460_v57, %v459_v6 }
 0x11e   :  { %v462_v0 = vrot.slane %v461_v27, 1 }
 0x11f   :  { %v469_v20 = vpop.xlane.xlu0 %468 }
 0x120   :  { %v463_v9 = vadd.f32 %v462_v0, %v461_v27  ;;  %v470_v25 = vrot.slane %v469_v20, 4 }
 0x122   :  { %528 = vpush %v463_v9  ;;  %v471_v34 = vadd.f32 %v470_v25, %v469_v20 }
 0x124   :  { %v472_v40 = vrot.slane %v471_v34, 2 }
 0x126   :  { %v473_v52 = vadd.f32 %v472_v40, %v471_v34 }
 0x128   :  { %v474_v41 = vrot.slane %v473_v52, 1 }
 0x12a   :  { %v475_v1 = vadd.f32 %v474_v41, %v473_v52 }
 0x12c   :  { %530 = vpush %v475_v1 }
 0x153   :  { %s529_s4 = spop %528 }
 0x15d   :  { %s531_s20 = spop %530 }
 0x15e   :  { %s477_s21 = sadd.f32 %s531_s20, %s529_s4 }
 0x160   :  { %s478_s5 = smul.f32 -0.5, %s477_s21 }
 0x162   :  { %s527_s22 = sadd.f32 -499.90256, %s478_s5 }
 0x164   :  { %481 = sst [smem:[#allocation11]] %s527_s22 }
 0x165   :  { %511 = dma.smem_to_hbm %s711_s23, 16, %s1229_s6, [#allocation5]  }
 0x166   :  { %699 = dma.done.wait [#allocation4], 2048  }
 0x167   :  { %700 = vsyncadd [#allocation4], 4294965248 }
 0x168   :  { %701 = dma.done.wait [#allocation10], 16  }
 0x169   :  { %702 = vsyncadd [#allocation10], 4294967280 }
 0x16a   :  { %703 = dma.done.wait [#allocation5], 16  }
 0x16b   :  { %704 = vsyncadd [#allocation5], 4294967280 }
 0x16c   :  { %521 = sfence }
 0x16d   :  { %522 = vsyncpa [#allocation3], 1 }
 0x16e   :  { %523 = vsyncpa [#allocation7], 1 }
 0x16f   :  { %524 = vsyncpa [#allocation4], 1 }
 0x170   :  { %525 = vsyncpa [#allocation10], 1 }
 0x171   :  { %526 = vsyncpa [#allocation5], 1 }

</bundles_post_ra>
